<compile_context>
chip_gen: v7x
topology: tpu7x:2x2x1
jax: 0.10.0
libtpu: 0.0.40
codegen_flags: <defaults>
</compile_context>

<pallas_src>
import functools

import jax
import jax.numpy as jnp
from jax.experimental import pallas as pl
from jax.experimental.pallas import tpu as pltpu


def _round_up(x, m):
    return (x + m - 1) // m * m


def _fused_lrelu_bias_kernel(x_ref, b_ref, o_ref, *, negative_slope, scale):
    # x_ref: (tm, tn) tile, b_ref: (tm, 1) per-row bias -> broadcast add (VPU).
    v = x_ref[...] + b_ref[...]
    # sqrt(2) scale folded into the select: one select + one mul per element.
    o_ref[...] = v * jnp.where(v >= 0, scale, scale * negative_slope)


def _fused_lrelu_kernel(x_ref, o_ref, *, negative_slope, scale):
    v = x_ref[...]
    o_ref[...] = v * jnp.where(v >= 0, scale, scale * negative_slope)


def fused_leaky_relu(x, bias=None, negative_slope=0.2, scale=2.0 ** 0.5):
    """x: (N, C, H, W). bias: (C,) or None. Matches the PyTorch fused op."""
    n, c, h, w = x.shape
    rows, cols = n * c, h * w
    dtype = x.dtype
    itemsize = jnp.dtype(dtype).itemsize

    # Sublane alignment: 8 rows (32-bit), 16 (16-bit), 32 (8-bit packed).
    sub = {4: 8, 2: 16, 1: 32}.get(itemsize, 8)

    # Lane-dense 2D view: rows = N*C, lanes = H*W (free contiguous reshape).
    x2d = x.reshape(rows, cols)

    # ---- tile selection: exact-shape cdiv grid, no array padding ----------
    MAX_TN = 2048
    # tn is either the full column extent (always a legal block dim) or a
    # multiple of 128; edge blocks along columns are masked by Pallas.
    tn = cols if cols <= MAX_TN else MAX_TN

    # ~3 MiB of input per tile: big enough to amortize the ~0.35us per-step
    # pipeline overhead, small enough that 2x in + 2x out + bias buffers fit
    # every generation's scoped-VMEM default (16/32/32 MiB on v5e/v6e/v7x).
    target_bytes = 3 * 1024 * 1024
    target_rows = max(sub, (target_bytes // itemsize // max(tn, 1)) // sub * sub)
    tm = rows if rows <= target_rows else target_rows

    grid_rows = pl.cdiv(rows, tm)
    grid_cols = pl.cdiv(cols, tn)
    # v7x has 2 TensorCores sharing HBM: make sure the parallel (row) axis
    # has >= 2 blocks when the row count allows it (no-op on v5e/v6e).
    if grid_rows * grid_cols < 2 and rows >= 2 * sub:
        tm = _round_up(pl.cdiv(rows, 2), sub)
        grid_rows = pl.cdiv(rows, tm)
    grid = (grid_rows, grid_cols)

    kernel_kwargs = dict(negative_slope=float(negative_slope), scale=float(scale))
    x_spec = pl.BlockSpec((tm, tn), lambda i, j: (i, j))
    o_spec = pl.BlockSpec((tm, tn), lambda i, j: (i, j))
    out_shape = jax.ShapeDtypeStruct((rows, cols), dtype)

    n_elem = rows * cols
    bias_bytes = rows * itemsize if bias is not None else 0
    cost = pl.CostEstimate(
        flops=4 * n_elem,
        transcendentals=0,
        bytes_accessed=2 * n_elem * itemsize + bias_bytes,
    )
    # Rows ("parallel") sharded across cores; columns innermost ("arbitrary")
    # so the bias block index (i, 0) is constant across consecutive steps.
    cparams = pltpu.CompilerParams(dimension_semantics=("parallel", "arbitrary"))

    if bias is not None:
        # Per-row bias column (one value per (n, c) row of the 2D view);
        # decouples tile shape from channel boundaries.  Note the (tm, 1)
        # tile pads to (tm, 128) lanes in VMEM -- tiny vs the data tiles.
        brow = jnp.broadcast_to(
            bias.astype(dtype).reshape(1, c), (n, c)
        ).reshape(rows, 1)
        out2d = pl.pallas_call(
            functools.partial(_fused_lrelu_bias_kernel, **kernel_kwargs),
            out_shape=out_shape,
            grid=grid,
            in_specs=[x_spec, pl.BlockSpec((tm, 1), lambda i, j: (i, 0))],
            out_specs=o_spec,
            compiler_params=cparams,
            cost_estimate=cost,
        )(x2d, brow)
    else:
        out2d = pl.pallas_call(
            functools.partial(_fused_lrelu_kernel, **kernel_kwargs),
            out_shape=out_shape,
            grid=grid,
            in_specs=[x_spec],
            out_specs=o_spec,
            compiler_params=cparams,
            cost_estimate=cost,
        )(x2d)

    return out2d.reshape(n, c, h, w)


class FusedLeakyReLU:
    """JAX/Pallas port of the PyTorch FusedLeakyReLU module."""

    def __init__(self, channel, bias=True, negative_slope=0.2, scale=2.0 ** 0.5,
                 key=None):
        if bias:
            # PyTorch __init__ uses zeros; use a non-zero init when a key is
            # given so the bias-add path is actually exercised in the test.
            if key is None:
                self.bias = jnp.zeros((channel,), dtype=jnp.float32)
            else:
                self.bias = jax.random.normal(key, (channel,), dtype=jnp.float32)
        else:
            self.bias = None
        self.negative_slope = negative_slope
        self.scale = scale

    def __call__(self, x):
        return fused_leaky_relu(x, self.bias, self.negative_slope, self.scale)


def _reference(x, bias, negative_slope=0.2, scale=2.0 ** 0.5):
    if bias is not None:
        x = x + bias.reshape(1, -1, 1, 1)
    return jnp.where(x >= 0, x, x * negative_slope) * scale


if __name__ == "__main__":
    key = jax.random.PRNGKey(0)
    kx, kb, kx2 = jax.random.split(key, 3)

    # Main test: small, aligned StyleGAN-like shape, bias path.
    N, C, H, W = 2, 4, 16, 16
    x = jax.random.normal(kx, (N, C, H, W), dtype=jnp.float32)
    module = FusedLeakyReLU(C, bias=True, key=kb)
    out = jax.block_until_ready(module(x))
    ref = _reference(x, module.bias)
    assert out.shape == (N, C, H, W)
    assert out.dtype == x.dtype
    assert jnp.allclose(out, ref, atol=1e-6, rtol=1e-6), "mismatch vs reference"

    # Second test: unaligned rows/cols (partial edge blocks, no padding) and
    # the bias-free kernel variant.
    x2 = jax.random.normal(kx2, (2, 3, 48, 48), dtype=jnp.float32)  # rows=6, cols=2304
    out2 = jax.block_until_ready(fused_leaky_relu(x2, None))
    ref2 = _reference(x2, None)
    assert out2.shape == x2.shape
    assert jnp.allclose(out2, ref2, atol=1e-6, rtol=1e-6), "mismatch (no-bias path)"

    print("KERNEL_OK")
</pallas_src>

<mosaic_0001>
module attributes {stable_mosaic.version = 11 : i64} {
  func.func @_fused_lrelu_bias_kernel(%arg0: i32, %arg1: i32, %arg2: memref<8x256xf32, #tpu.memory_space<vmem>>, %arg3: memref<8x1xf32, #tpu.memory_space<vmem>>, %arg4: memref<8x256xf32, #tpu.memory_space<vmem>>) attributes {dimension_semantics = [#tpu.dimension_semantics<parallel>, #tpu.dimension_semantics<arbitrary>], iteration_bounds = array<i64: 1, 1>, scalar_prefetch = 0 : i64, scratch_operands = 0 : i64, tpu.core_type = #tpu.core_type<tc>, window_params = [{transform_indices = @transform_0, window_bounds = array<i64: 8, 256>}, {transform_indices = @transform_1, window_bounds = array<i64: 8, 1>}, {transform_indices = @transform_2, window_bounds = array<i64: 8, 256>}]} {
    %c0 = arith.constant 0 : index
    %c0_0 = arith.constant 0 : index
    %0 = vector.load %arg2[%c0, %c0_0] : memref<8x256xf32, #tpu.memory_space<vmem>>, vector<8x256xf32>
    %c0_1 = arith.constant 0 : index
    %c0_2 = arith.constant 0 : index
    %1 = vector.load %arg3[%c0_1, %c0_2] : memref<8x1xf32, #tpu.memory_space<vmem>>, vector<8x1xf32>
    %2 = vector.broadcast %1 : vector<8x1xf32> to vector<8x256xf32>
    %3 = arith.addf %0, %2 : vector<8x256xf32>
    %cst = arith.constant 0.000000e+00 : f32
    %4 = vector.broadcast %cst : f32 to vector<8x256xf32>
    %5 = arith.cmpf oge, %3, %4 : vector<8x256xf32>
    %cst_3 = arith.constant 1.41421354 : f32
    %cst_4 = arith.constant 0.282842726 : f32
    %6 = vector.broadcast %cst_3 : f32 to vector<8x256xf32>
    %7 = vector.broadcast %cst_4 : f32 to vector<8x256xf32>
    %8 = arith.select %5, %6, %7 : vector<8x256xi1>, vector<8x256xf32>
    %9 = arith.mulf %3, %8 : vector<8x256xf32>
    %c0_5 = arith.constant 0 : index
    %c0_6 = arith.constant 0 : index
    %10 = vector.load %arg4[%c0_5, %c0_6] : memref<8x256xf32, #tpu.memory_space<vmem>>, vector<8x256xf32>
    tpu.vector_store %arg4[%c0_5, %c0_6], %9 {strides = array<i32>} : memref<8x256xf32, #tpu.memory_space<vmem>>, vector<8x256xf32>,
    return
  }
  func.func @transform_0(%arg0: i32, %arg1: i32) -> (i32, i32) {
    %c0_i32 = arith.constant 0 : i32
    return %arg0, %arg1 : i32, i32
  }
  func.func @transform_1(%arg0: i32, %arg1: i32) -> (i32, i32) {
    %c0_i32 = arith.constant 0 : i32
    %c0_i32_0 = arith.constant 0 : i32
    return %arg0, %c0_i32 : i32, i32
  }
  func.func @transform_2(%arg0: i32, %arg1: i32) -> (i32, i32) {
    %c0_i32 = arith.constant 0 : i32
    return %arg0, %arg1 : i32, i32
  }
}

</mosaic_0001>

<bundles_post_ra>
// kernel: tpu_custom_call.1
= control target key start
LH: loop header
LB: loop body
LE: loop exit
PB: predicated region body
PF: predicated region fallthrough
CT: control target
= control target key end

     0   :  { %7 = vsyncpa [#allocation3], 0  ;;  %s156_s0 = inlined_call_operand.hbm [shape: f32[8,256], index: 0, kind: input, shape index: {}]   ;;  %s157_s1 = inlined_call_operand.vmem [shape: f32[8,1], index: 1, kind: input, shape index: {}]   ;;  %s158_s2 = inlined_call_operand.hbm [shape: f32[8,256], index: 2, kind: output, shape index: {}]  }
   0x1   :  { %8 = vsyncpa [#allocation4], 0  ;;  %s110_s9 = smov [#allocation2]   ;;  %s62_s13 = scalar_lea.hbm %s156_s0, 256 }
   0x2   :  { %s15_s10 = sshll.u32 %s110_s9, 4  ;;  %p63_p0 = scmp.ne.s32.totalorder %s156_s0, %s62_s13  ;;  %s16_s10 = int_to_ptr.vmem [resolvable:$true] %s15_s10 }
   0x3   :  { %p66_p1 = scmp.lt.u32.totalorder %s62_s13, %s156_s0 }
   0x5   :  { %p68_p2 = pnand %p66_p1, %p63_p0 }
   0x7   :  { %71 = shalt.err (!%p68_p2)
}
   0x8   :  { %s72_s18 = scalar_lea.vmem %s16_s10, 256  ;;  %p77_p4 = scmp.lt.s32.totalorder %s16_s10, %s16_s10 }
   0x9   :  { %p73_p3 = scmp.ne.s32.totalorder %s16_s10, %s72_s18  ;;  %p78_p5 = scmp.lt.s32.totalorder %s72_s18, %s72_s18 }
   0xb   :  { %p79_p6 = por %p78_p5, %p77_p4 }
   0xd   :  { %p80_p7 = pnand %p79_p6, %p73_p3 }
   0xf   :  { %83 = shalt.err (!%p80_p7)
}
  0x10   :  { %18 = dma.hbm_to_vmem [thread:$0]  %s156_s0, 256, %s16_s10, [#allocation3]  }
  0x11   :  { %106 = dma.done.wait [#allocation3], 256  }
  0x12   :  { %107 = vsyncadd [#allocation3], 4294967040  ;;  %v111_v0 = vmov 0   ;;  %v26_v1 = vld [vmem:[%s157_s1] sm:$0xff]  ;;  %v25_v3 = vld [vmem:[#allocation2 + $0x8] sm:$0xff]  ;;  %s112_s23 = smov [#allocation5]  }
  0x13   :  { %61 = vset.pattern.permute.xlu0 %v111_v0  ;;  %v24_v2 = vld [vmem:[#allocation2] sm:$0xff]  ;;  %s48_s24 = sshll.u32 %s112_s23, 4  ;;  %v113_v7 = vmov 0.28284273   ;;  %s49_s24 = int_to_ptr.vmem [resolvable:$true] %s48_s24 }
  0x14   :  { %29 = vperm.xlu0 %61, %v26_v1   ;;  %s84_s0 = scalar_lea.vmem %s49_s24, 256  ;;  %p89_p9 = scmp.lt.s32.totalorder %s49_s24, %s49_s24 }
  0x15   :  { %p85_p8 = scmp.ne.s32.totalorder %s49_s24, %s84_s0  ;;  %p90_p10 = scmp.lt.s32.totalorder %s84_s0, %s84_s0 }
  0x17   :  { %p91_p11 = por %p90_p10, %p89_p9 }
  0x19   :  { %p92_p12 = pnand %p91_p11, %p85_p8 }
  0x93   :  { %v30_v4 = vpop.permute.xlu0 %29 }
  0x94   :  { %v32_v5 = vadd.f32 %v30_v4, %v24_v2  ;;  %v33_v6 = vadd.f32 %v30_v4, %v25_v3 }
  0x96   :  { %vm34_vm0 = vcmp.ge.f32.partialorder %v32_v5, 0.0  ;;  %vm35_vm1 = vcmp.ge.f32.partialorder %v33_v6, 0.0 }
  0x97   :  { %v36_v8 = vsel %vm34_vm0, 1.4142135, %v113_v7  ;;  %v37_v9 = vsel %vm35_vm1, 1.4142135, %v113_v7 }
  0x98   :  { %v38_v10 = vmul.f32 %v36_v8, %v32_v5  ;;  %v39_v11 = vmul.f32 %v37_v9, %v33_v6 }
  0x9a   :  { %40 = vst [vmem:[#allocation5] sm:$0xff] %v38_v10  ;;  %41 = vst [vmem:[#allocation5 + $0x8] sm:$0xff] %v39_v11 }
  0x9b   :  { %95 = shalt.err (!%p92_p12)
}
  0x9c   :  { %s96_s26 = scalar_lea.hbm %s158_s2, 256 }
  0x9d   :  { %p97_p13 = scmp.ne.s32.totalorder %s158_s2, %s96_s26  ;;  %p100_p0 = scmp.lt.u32.totalorder %s96_s26, %s158_s2 }
  0x9f   :  { %p102_p1 = pnand %p100_p0, %p97_p13 }
  0xa1   :  { %105 = shalt.err (!%p102_p1)
}
  0xa2   :  { %51 = dma.vmem_to_hbm [thread:$0]  %s49_s24, 256, %s158_s2, [#allocation4]  }
  0xa3   :  { %108 = dma.done.wait [#allocation4], 256  }
  0xa4   :  { %109 = vsyncadd [#allocation4], 4294967040 }
  0xa5   :  { %55 = vsyncpa [#allocation3], 1 }
  0xa6   :  { %56 = vsyncpa [#allocation4], 1 }

</bundles_post_ra>
